<compile_context>
chip_gen: v7x
topology: tpu7x:2x2x1
jax: 0.10.0
libtpu: 0.0.40
codegen_flags: <defaults>
</compile_context>

<pallas_src>
import jax
import jax.numpy as jnp
from jax import lax
from jax.experimental import pallas as pl
from jax.experimental.pallas import tpu as pltpu

LN_EPS = 1e-6


def _layernorm_residual(y_f32, x_f32, b2_f32, g_f32, beta_f32, out_dtype):
    # bias2 + residual, then LayerNorm with two-pass (mean-subtracted) variance, all f32.
    y = y_f32 + b2_f32 + x_f32
    mean = jnp.mean(y, axis=-1, keepdims=True)
    yc = y - mean
    var = jnp.mean(yc * yc, axis=-1, keepdims=True)
    inv = lax.rsqrt(var + LN_EPS)
    return (yc * inv * g_f32 + beta_f32).astype(out_dtype)


def ffn_kernel_resident(x_ref, w1_ref, b1_ref, w2_ref, b2_ref, g_ref, beta_ref, o_ref):
    # 1-D grid over row tiles; w1/w2/biases have constant index_maps -> resident in VMEM.
    x = x_ref[...]  # native dtype -> fast MXU path, f32 accumulation
    h = jnp.dot(x, w1_ref[...], preferred_element_type=jnp.float32)
    h = jnp.maximum(h + b1_ref[...].astype(jnp.float32), 0.0)
    y = jnp.dot(h.astype(w2_ref.dtype), w2_ref[...], preferred_element_type=jnp.float32)
    o_ref[...] = _layernorm_residual(
        y, x.astype(jnp.float32),
        b2_ref[...].astype(jnp.float32),
        g_ref[...].astype(jnp.float32),
        beta_ref[...].astype(jnp.float32),
        o_ref.dtype)


def ffn_kernel_streamed(x_ref, w1_ref, b1_ref, w2_ref, b2_ref, g_ref, beta_ref,
                        o_ref, acc_ref):
    # 2-D grid: rows (parallel) x hidden chunks (arbitrary, reduction axis last).
    # x_ref:  (TILE_N, D_IN)      w1_ref: (D_IN, TILE_H)   b1_ref: (NK, TILE_H) resident
    # w2_ref: (TILE_H, D_IN)      b2/g/beta: (1, D_IN)     acc_ref: (TILE_N, D_IN) f32
    k = pl.program_id(1)
    nk = pl.num_programs(1)

    @pl.when(k == 0)
    def _():
        acc_ref[...] = jnp.zeros_like(acc_ref)

    x = x_ref[...]
    h = jnp.dot(x, w1_ref[...], preferred_element_type=jnp.float32)
    b1c = b1_ref[pl.ds(k, 1), :].astype(jnp.float32)  # (1, TILE_H); resident bias table
    h = jnp.maximum(h + b1c, 0.0)
    acc_ref[...] += jnp.dot(h.astype(w2_ref.dtype), w2_ref[...],
                            preferred_element_type=jnp.float32)

    @pl.when(k == nk - 1)
    def _():
        o_ref[...] = _layernorm_residual(
            acc_ref[...], x.astype(jnp.float32),
            b2_ref[...].astype(jnp.float32),
            g_ref[...].astype(jnp.float32),
            beta_ref[...].astype(jnp.float32),
            o_ref.dtype)


def _round_up(a, b):
    return (a + b - 1) // b * b


def _vmem_budget():
    """(usable VMEM budget bytes, vmem_limit cap bytes), chip-aware."""
    try:
        cap = int(pltpu.get_tpu_info().vmem_capacity_bytes)
    except Exception:
        cap = 64 << 20                   # be conservative (v7x-class) if query fails
    if cap >= (128 << 20):               # v5e / v6e: 128 MiB physical per core
        return 96 << 20, 100 << 20
    return 40 << 20, 56 << 20            # v7x-class: 64 MiB physical, leave headroom


def positionwise_ffn(x, w1, b1, w2, b2, gamma, beta):
    """x: [B, S, d_in]; w1: [d_in, d_hid]; w2: [d_hid, d_in] (pre-transposed).
    Returns [B, S, d_in]."""
    B, S, d_in = x.shape
    d_hid = w1.shape[1]
    N = B * S

    x_isz = x.dtype.itemsize
    w_isz = w1.dtype.itemsize
    # Sub-32-bit dtypes pack along sublanes: align row tiles to 8 (f32), 16 (bf16), 32 (8-bit).
    align = 8 * max(1, 4 // x_isz)

    budget, vmem_cap = _vmem_budget()

    # ---- row tile: largest aligned candidate whose padding waste is <= 25% ----------
    cands = [c for c in (768, 512, 384, 256, 128, 64, 32, 16, 8) if c % align == 0]
    if not cands:
        cands = [align]
    tile_n = cands[-1]
    for c in cands:
        n_pad = _round_up(max(N, align), c)
        if (n_pad - N) * 4 <= n_pad:
            tile_n = c
            break

    def resident_need(tn):
        return (2 * 2 * tn * d_in * x_isz            # x + out tiles (double-buffered)
                + 2 * 2 * d_in * d_hid * w_isz       # w1 + w2 (double-buffered)
                + 2 * (d_hid + 3 * d_in) * 4         # b1 / b2 / gamma / beta
                + tn * d_hid * 4                     # h intermediate (f32)
                + 2 * tn * d_in * 4)                 # epilogue temporaries

    def streamed_need(tn, th):
        return (2 * 2 * tn * d_in * x_isz            # x + out tiles
                + 2 * 2 * d_in * th * w_isz          # w1 + w2 chunks (double-buffered)
                + 2 * (d_hid + 3 * d_in) * 4         # resident b1 table + small params
                + tn * d_in * 4                      # f32 accumulator scratch
                + tn * th * 4                        # h intermediate (f32)
                + 2 * tn * d_in * 4)                 # epilogue temporaries

    # ---- weight residency is the first-class decision -------------------------------
    resident_tn = None
    floor_tn = min(tile_n, 256)                      # don't shrink rows below 256 just to fit
    for tn in sorted({c for c in cands if floor_tn <= c <= tile_n}, reverse=True):
        if resident_need(tn) <= budget:
            resident_tn = tn
            break

    if resident_tn is not None:
        tile_n = resident_tn
        tile_h = d_hid
    else:
        th_cands = [c for c in (2048, 1024, 512, 256, 128) if d_hid % c == 0] or [d_hid]
        tile_h = th_cands[-1]
        for th in th_cands:                          # largest chunk that fits -> fewest k steps
            if streamed_need(tile_n, th) <= budget:
                tile_h = th
                break

    # ---- make sure the "parallel" row axis has >= 2 tiles (v7x has 2 TensorCores) ----
    N_pad = _round_up(max(N, align), tile_n)
    if N_pad // tile_n == 1 and tile_n >= 2 * align:
        tile_n = max(align, (tile_n // 2) // align * align)
        N_pad = _round_up(max(N, align), tile_n)
    grid_rows = N_pad // tile_n

    x2d = x.reshape(N, d_in)
    if N_pad != N:
        # Padded rows go through residual+LayerNorm with garbage-but-finite stats; they
        # are sliced away before reshaping and never observed.
        x2d = jnp.pad(x2d, ((0, N_pad - N), (0, 0)))

    b2_2d = b2.reshape(1, d_in)
    g_2d = gamma.reshape(1, d_in)
    beta_2d = beta.reshape(1, d_in)

    weight_bytes = w1.size * w1.dtype.itemsize + w2.size * w2.dtype.itemsize
    small_param_bytes = (b1.size * b1.dtype.itemsize + b2.size * b2.dtype.itemsize
                         + gamma.size * gamma.dtype.itemsize + beta.size * beta.dtype.itemsize)

    if resident_tn is not None:
        need = resident_need(tile_n)
        restream = 1                                  # weights read from HBM once
    else:
        need = streamed_need(tile_n, tile_h)
        restream = grid_rows                          # weights re-streamed per row tile

    vmem_limit = int(min(max(need * 3 // 2 + (4 << 20), 32 << 20), vmem_cap))

    cost = pl.CostEstimate(
        flops=4 * N_pad * d_in * d_hid,
        transcendentals=N_pad,
        bytes_accessed=int(x2d.size * x_isz + N_pad * d_in * x_isz
                           + weight_bytes * restream + small_param_bytes),
    )

    if resident_tn is not None:
        b1_2d = b1.reshape(1, d_hid)
        out = pl.pallas_call(
            ffn_kernel_resident,
            out_shape=jax.ShapeDtypeStruct((N_pad, d_in), x.dtype),
            grid_spec=pltpu.PrefetchScalarGridSpec(
                num_scalar_prefetch=0,
                grid=(grid_rows,),
                in_specs=[
                    pl.BlockSpec((tile_n, d_in), lambda i: (i, 0)),   # x rows
                    pl.BlockSpec((d_in, d_hid), lambda i: (0, 0)),    # w1 (resident)
                    pl.BlockSpec((1, d_hid), lambda i: (0, 0)),       # b1 (resident)
                    pl.BlockSpec((d_hid, d_in), lambda i: (0, 0)),    # w2 (resident)
                    pl.BlockSpec((1, d_in), lambda i: (0, 0)),        # b2
                    pl.BlockSpec((1, d_in), lambda i: (0, 0)),        # gamma
                    pl.BlockSpec((1, d_in), lambda i: (0, 0)),        # beta
                ],
                out_specs=pl.BlockSpec((tile_n, d_in), lambda i: (i, 0)),
            ),
            compiler_params=pltpu.CompilerParams(
                dimension_semantics=("parallel",),
                vmem_limit_bytes=vmem_limit,
            ),
            cost_estimate=cost,
        )(x2d, w1, b1_2d, w2, b2_2d, g_2d, beta_2d)
    else:
        nk = d_hid // tile_h
        b1_chunks = b1.reshape(nk, tile_h)            # row k <-> hidden chunk k; resident
        out = pl.pallas_call(
            ffn_kernel_streamed,
            out_shape=jax.ShapeDtypeStruct((N_pad, d_in), x.dtype),
            grid_spec=pltpu.PrefetchScalarGridSpec(
                num_scalar_prefetch=0,
                grid=(grid_rows, nk),
                in_specs=[
                    pl.BlockSpec((tile_n, d_in), lambda i, k: (i, 0)),   # x rows
                    pl.BlockSpec((d_in, tile_h), lambda i, k: (0, k)),   # w1 chunk
                    pl.BlockSpec((nk, tile_h), lambda i, k: (0, 0)),     # b1 table (resident)
                    pl.BlockSpec((tile_h, d_in), lambda i, k: (k, 0)),   # w2 chunk
                    pl.BlockSpec((1, d_in), lambda i, k: (0, 0)),        # b2
                    pl.BlockSpec((1, d_in), lambda i, k: (0, 0)),        # gamma
                    pl.BlockSpec((1, d_in), lambda i, k: (0, 0)),        # beta
                ],
                out_specs=pl.BlockSpec((tile_n, d_in), lambda i, k: (i, 0)),
                scratch_shapes=[pltpu.VMEM((tile_n, d_in), jnp.float32)],
            ),
            compiler_params=pltpu.CompilerParams(
                dimension_semantics=("parallel", "arbitrary"),
                vmem_limit_bytes=vmem_limit,
            ),
            cost_estimate=cost,
        )(x2d, w1, b1_chunks, w2, b2_2d, g_2d, beta_2d)

    return out[:N].reshape(B, S, d_in)


def _reference(x, w1, b1, w2, b2, gamma, beta):
    h = jnp.maximum(x @ w1 + b1, 0.0)
    y = h @ w2 + b2 + x
    mean = jnp.mean(y, axis=-1, keepdims=True)
    var = jnp.mean(jnp.square(y - mean), axis=-1, keepdims=True)
    return (y - mean) / jnp.sqrt(var + LN_EPS) * gamma + beta


if __name__ == "__main__":
    # Small shapes consistent with the module: batch=2, seq=8, d_in=32, d_hid=64
    B, S, D_IN, D_HID = 2, 8, 32, 64

    key = jax.random.PRNGKey(0)
    k_x, k_w1, k_b1, k_w2, k_b2 = jax.random.split(key, 5)

    x = jax.random.normal(k_x, (B, S, D_IN), dtype=jnp.float32)

    # Deterministic parameter init (Linear weights stored pre-transposed: [in, out])
    w1 = jax.random.normal(k_w1, (D_IN, D_HID), dtype=jnp.float32) * 0.1
    b1 = jax.random.normal(k_b1, (D_HID,), dtype=jnp.float32) * 0.1
    w2 = jax.random.normal(k_w2, (D_HID, D_IN), dtype=jnp.float32) * 0.1
    b2 = jax.random.normal(k_b2, (D_IN,), dtype=jnp.float32) * 0.1
    gamma = jnp.ones((D_IN,), dtype=jnp.float32)   # LayerNorm weight init
    beta = jnp.zeros((D_IN,), dtype=jnp.float32)   # LayerNorm bias init

    out = positionwise_ffn(x, w1, b1, w2, b2, gamma, beta)
    out = jax.block_until_ready(out)

    ref = _reference(x, w1, b1, w2, b2, gamma, beta)
    assert out.shape == (B, S, D_IN)
    assert jnp.allclose(out, ref, atol=1e-5, rtol=1e-5), "mismatch vs reference"

    print("KERNEL_OK")
</pallas_src>

<mosaic_0001>
module attributes {stable_mosaic.version = 11 : i64} {
  func.func @ffn_kernel_resident(%arg0: i32, %arg1: memref<8x32xf32, #tpu.memory_space<vmem>>, %arg2: memref<32x64xf32, #tpu.memory_space<vmem>>, %arg3: memref<1x64xf32, #tpu.memory_space<vmem>>, %arg4: memref<64x32xf32, #tpu.memory_space<vmem>>, %arg5: memref<1x32xf32, #tpu.memory_space<vmem>>, %arg6: memref<1x32xf32, #tpu.memory_space<vmem>>, %arg7: memref<1x32xf32, #tpu.memory_space<vmem>>, %arg8: memref<8x32xf32, #tpu.memory_space<vmem>>) attributes {dimension_semantics = [#tpu.dimension_semantics<parallel>], iteration_bounds = array<i64: 2>, scalar_prefetch = 0 : i64, scratch_operands = 0 : i64, tpu.core_type = #tpu.core_type<tc>, window_params = [{transform_indices = @transform_0, window_bounds = array<i64: 8, 32>}, {pipeline_mode = #tpu.pipeline_mode<synchronous>, transform_indices = @transform_1, window_bounds = array<i64: 32, 64>}, {pipeline_mode = #tpu.pipeline_mode<synchronous>, transform_indices = @transform_2, window_bounds = array<i64: 1, 64>}, {pipeline_mode = #tpu.pipeline_mode<synchronous>, transform_indices = @transform_3, window_bounds = array<i64: 64, 32>}, {pipeline_mode = #tpu.pipeline_mode<synchronous>, transform_indices = @transform_4, window_bounds = array<i64: 1, 32>}, {pipeline_mode = #tpu.pipeline_mode<synchronous>, transform_indices = @transform_5, window_bounds = array<i64: 1, 32>}, {pipeline_mode = #tpu.pipeline_mode<synchronous>, transform_indices = @transform_6, window_bounds = array<i64: 1, 32>}, {transform_indices = @transform_7, window_bounds = array<i64: 8, 32>}]} {
    %c0 = arith.constant 0 : index
    %c0_0 = arith.constant 0 : index
    %0 = vector.load %arg1[%c0, %c0_0] : memref<8x32xf32, #tpu.memory_space<vmem>>, vector<8x32xf32>
    %c0_1 = arith.constant 0 : index
    %c0_2 = arith.constant 0 : index
    %1 = vector.load %arg2[%c0_1, %c0_2] : memref<32x64xf32, #tpu.memory_space<vmem>>, vector<32x64xf32>
    %cst = arith.constant dense<0.000000e+00> : vector<8x64xf32>
    %2 = tpu.matmul %0, %1, %cst {dimension_numbers = #tpu.dot_dimension_numbers<[1], [0], [0], [1], [0, 0, 1, 1], [], []>} : vector<8x32xf32>, vector<32x64xf32>, vector<8x64xf32> -> vector<8x64xf32>
    %c0_3 = arith.constant 0 : index
    %c0_4 = arith.constant 0 : index
    %3 = vector.load %arg3[%c0_3, %c0_4] : memref<1x64xf32, #tpu.memory_space<vmem>>, vector<1x64xf32>
    %4 = vector.broadcast %3 : vector<1x64xf32> to vector<8x64xf32>
    %5 = arith.addf %2, %4 : vector<8x64xf32>
    %cst_5 = arith.constant 0.000000e+00 : f32
    %6 = vector.broadcast %cst_5 : f32 to vector<8x64xf32>
    %7 = arith.maximumf %5, %6 : vector<8x64xf32>
    %c0_6 = arith.constant 0 : index
    %c0_7 = arith.constant 0 : index
    %8 = vector.load %arg4[%c0_6, %c0_7] : memref<64x32xf32, #tpu.memory_space<vmem>>, vector<64x32xf32>
    %cst_8 = arith.constant dense<0.000000e+00> : vector<8x32xf32>
    %9 = tpu.matmul %7, %8, %cst_8 {dimension_numbers = #tpu.dot_dimension_numbers<[1], [0], [0], [1], [0, 0, 1, 1], [], []>} : vector<8x64xf32>, vector<64x32xf32>, vector<8x32xf32> -> vector<8x32xf32>
    %c0_9 = arith.constant 0 : index
    %c0_10 = arith.constant 0 : index
    %10 = vector.load %arg5[%c0_9, %c0_10] : memref<1x32xf32, #tpu.memory_space<vmem>>, vector<1x32xf32>
    %c0_11 = arith.constant 0 : index
    %c0_12 = arith.constant 0 : index
    %11 = vector.load %arg6[%c0_11, %c0_12] : memref<1x32xf32, #tpu.memory_space<vmem>>, vector<1x32xf32>
    %c0_13 = arith.constant 0 : index
    %c0_14 = arith.constant 0 : index
    %12 = vector.load %arg7[%c0_13, %c0_14] : memref<1x32xf32, #tpu.memory_space<vmem>>, vector<1x32xf32>
    %13 = vector.broadcast %10 : vector<1x32xf32> to vector<8x32xf32>
    %14 = arith.addf %9, %13 : vector<8x32xf32>
    %15 = arith.addf %14, %0 : vector<8x32xf32>
    %cst_15 = arith.constant dense<0.000000e+00> : vector<8xf32>
    %16 = vector.multi_reduction <add>, %15, %cst_15 [1] : vector<8x32xf32> to vector<8xf32>
    %17 = vector.shape_cast %16 : vector<8xf32> to vector<8x1xf32>
    %cst_16 = arith.constant 3.200000e+01 : f32
    %18 = vector.broadcast %cst_16 : f32 to vector<8x1xf32>
    %19 = arith.divf %17, %18 : vector<8x1xf32>
    %20 = vector.broadcast %19 : vector<8x1xf32> to vector<8x32xf32>
    %21 = arith.subf %15, %20 : vector<8x32xf32>
    %22 = arith.mulf %21, %21 : vector<8x32xf32>
    %cst_17 = arith.constant dense<0.000000e+00> : vector<8xf32>
    %23 = vector.multi_reduction <add>, %22, %cst_17 [1] : vector<8x32xf32> to vector<8xf32>
    %24 = vector.shape_cast %23 : vector<8xf32> to vector<8x1xf32>
    %cst_18 = arith.constant 3.200000e+01 : f32
    %25 = vector.broadcast %cst_18 : f32 to vector<8x1xf32>
    %26 = arith.divf %24, %25 : vector<8x1xf32>
    %cst_19 = arith.constant 9.99999997E-7 : f32
    %27 = vector.broadcast %cst_19 : f32 to vector<8x1xf32>
    %28 = arith.addf %26, %27 : vector<8x1xf32>
    %29 = math.rsqrt %28 : vector<8x1xf32>
    %30 = vector.broadcast %29 : vector<8x1xf32> to vector<8x32xf32>
    %31 = arith.mulf %21, %30 : vector<8x32xf32>
    %32 = vector.broadcast %11 : vector<1x32xf32> to vector<8x32xf32>
    %33 = arith.mulf %31, %32 : vector<8x32xf32>
    %34 = vector.broadcast %12 : vector<1x32xf32> to vector<8x32xf32>
    %35 = arith.addf %33, %34 : vector<8x32xf32>
    %c0_20 = arith.constant 0 : index
    %c0_21 = arith.constant 0 : index
    %36 = vector.load %arg8[%c0_20, %c0_21] : memref<8x32xf32, #tpu.memory_space<vmem>>, vector<8x32xf32>
    tpu.vector_store %arg8[%c0_20, %c0_21], %35 {strides = array<i32>} : memref<8x32xf32, #tpu.memory_space<vmem>>, vector<8x32xf32>,
    return
  }
  func.func @transform_0(%arg0: i32) -> (i32, i32) {
    %c0_i32 = arith.constant 0 : i32
    %c0_i32_0 = arith.constant 0 : i32
    return %arg0, %c0_i32 : i32, i32
  }
  func.func @transform_1(%arg0: i32) -> (i32, i32) {
    %c0_i32 = arith.constant 0 : i32
    %c0_i32_0 = arith.constant 0 : i32
    %c0_i32_1 = arith.constant 0 : i32
    return %c0_i32, %c0_i32_0 : i32, i32
  }
  func.func @transform_2(%arg0: i32) -> (i32, i32) {
    %c0_i32 = arith.constant 0 : i32
    %c0_i32_0 = arith.constant 0 : i32
    %c0_i32_1 = arith.constant 0 : i32
    return %c0_i32, %c0_i32_0 : i32, i32
  }
  func.func @transform_3(%arg0: i32) -> (i32, i32) {
    %c0_i32 = arith.constant 0 : i32
    %c0_i32_0 = arith.constant 0 : i32
    %c0_i32_1 = arith.constant 0 : i32
    return %c0_i32, %c0_i32_0 : i32, i32
  }
  func.func @transform_4(%arg0: i32) -> (i32, i32) {
    %c0_i32 = arith.constant 0 : i32
    %c0_i32_0 = arith.constant 0 : i32
    %c0_i32_1 = arith.constant 0 : i32
    return %c0_i32, %c0_i32_0 : i32, i32
  }
  func.func @transform_5(%arg0: i32) -> (i32, i32) {
    %c0_i32 = arith.constant 0 : i32
    %c0_i32_0 = arith.constant 0 : i32
    %c0_i32_1 = arith.constant 0 : i32
    return %c0_i32, %c0_i32_0 : i32, i32
  }
  func.func @transform_6(%arg0: i32) -> (i32, i32) {
    %c0_i32 = arith.constant 0 : i32
    %c0_i32_0 = arith.constant 0 : i32
    %c0_i32_1 = arith.constant 0 : i32
    return %c0_i32, %c0_i32_0 : i32, i32
  }
  func.func @transform_7(%arg0: i32) -> (i32, i32) {
    %c0_i32 = arith.constant 0 : i32
    %c0_i32_0 = arith.constant 0 : i32
    return %arg0, %c0_i32 : i32, i32
  }
}

</mosaic_0001>

<bundles_post_ra>
// kernel: tpu_custom_call.1
= control target key start
LH: loop header
LB: loop body
LE: loop exit
PB: predicated region body
PF: predicated region fallthrough
CT: control target
= control target key end

     0   :  { %12 = vsyncpa [#allocation3], 0  ;;  %s937_s0 = inlined_call_operand.vmem [shape: f32[16,32], index: 0, kind: input, shape index: {}]   ;;  %s938_s1 = inlined_call_operand.vmem [shape: f32[32,64], index: 1, kind: input, shape index: {}]   ;;  %s939_s2 = inlined_call_operand.vmem [shape: f32[1,64], index: 2, kind: input, shape index: {}]   ;;  %s940_s3 = inlined_call_operand.vmem [shape: f32[64,32], index: 3, kind: input, shape index: {}]   ;;  %s941_s4 = inlined_call_operand.vmem [shape: f32[1,32], index: 4, kind: input, shape index: {}]   ;;  %s942_s5 = inlined_call_operand.vmem [shape: f32[1,32], index: 5, kind: input, shape index: {}]   ;;  %s943_s6 = inlined_call_operand.vmem [shape: f32[1,32], index: 6, kind: input, shape index: {}]   ;;  %s944_s7 = inlined_call_operand.hbm [shape: f32[16,32], index: 7, kind: output, shape index: {}]  }
   0x1   :  { %14 = vsyncpa [#allocation3 + $0x1], 0  ;;  %s785_s24 = smov 0   ;;  %s787_s25 = smov 0  }
   0x2   :  { %s789_s26 = smov 0   ;;  %s791_s27 = smov 0  }
   0x3 LB: > { %s806_s28 = sadd.s32 4294967295, %s739_s27   ;;  %s555_s29 = sadd.s32 4294967294, %s739_s27   ;;  %s739_s27 = sphi %s791_s27, %s950_s27   ;;  %s735_s26 = sphi %s789_s26, %s949_s26   ;;  %s731_s25 = sphi %s787_s25, %s948_s25   ;;  %s727_s24 = sphi %s785_s24, %s947_s24  }
   0x4   : > { %s810_s30 = sadd.s32 1, %s739_s27   ;;  %s179_s8 = sadd.s32 1, %s735_s26 }
   0x5   : > { %s176_s9 = ssub.s32 %s739_s27, %s810_s30  ;;  %p189_p0 = scmp.ne.s32.totalorder %s735_s26, %s731_s25 }
   0x6   : > { %p177_p1 = scmp.eq.s32.totalorder %s176_s9, 0  ;;  %p190_p2 = scmp.eq.s32.totalorder %s806_s28, 1 }
   0x7   : > { %p195_p3 = scmp.ne.s32.totalorder %s731_s25, %s727_s24  ;;  %p196_p4 = scmp.eq.s32.totalorder %s555_s29, 1 }
   0x8   : > { %s821_s10 = scalar_select %p177_p1, %s735_s26, %s179_s8  }
   0x9   : > { %p823_p5 = por %p190_p2, %p189_p0  ;;  %p827_p6 = por %p196_p4, %p195_p3 }
   0xa   : > { %p558_p7 = scmp.ge.s32.totalorder %s739_s27, 1  ;;  %p239_p8 = scmp.lt.s32.totalorder %s739_s27, 3 }
   0xc   : > { %p240_p9 = pnand %p558_p7, %p239_p8 }
   0xd   : > { %v275_v0 = vld [vmem:[%s938_s1] sm:$0xff] (!%p240_p9)  ;;  %v276_v1 = vld [vmem:[%s938_s1 + $0x8] sm:$0xff] (!%p240_p9)  ;;  %v277_v2 = vld [vmem:[%s938_s1 + $0x10] sm:$0xff] (!%p240_p9)  ;;  %v741_v3 = vmov (!%p240_p9), 0.0|0.0   ;;  %vm742_vm0 = vmmov (!%p240_p9), 0   ;;  %v743_v6 = vmov (!%p240_p9), 0.0  }
   0xe   : > { %243 = sbr.rel (%p240_p9) target bundleno = 785 (0x311), region = 48  ;;  %615 = vmatprep.subr.bf16.mxu0 (!%p240_p9), %v741_v3  ;;  %v616_v4 = vpack.c.bf16 (!%p240_p9), %v276_v1, %v275_v0  ;;  %v278_v5 = vld [vmem:[%s938_s1 + $0x18] sm:$0xff] (!%p240_p9)  ;;  %593 = vmatprep.mubr.msk.f32.mxu0 (!%p240_p9), %vm742_vm0, %v743_v6  ;;  %p270_p10 = scmp.lt.s32.totalorder (!%p240_p9), %s806_s28, 1  ;;  %v361_v7 = vld [vmem:[%s940_s3] sm:$0xff] (!%p240_p9)  ;;  %v362_v8 = vld [vmem:[%s940_s3 + $0x8] sm:$0xff] (!%p240_p9)  ;;  %vm286_vm1 = vcmask (!%p240_p9), 261120  }
   0xf   : > { %621 = vmatprep.subr.bf16.mxu1 (!%p240_p9), %v741_v3  ;;  %v622_v9 = vpack.c.bf16 (!%p240_p9), %v362_v8, %v361_v7  ;;  %v363_v10 = vld [vmem:[%s940_s3 + $0x10] sm:$0xff] (!%p240_p9)  ;;  %v364_v11 = vld [vmem:[%s940_s3 + $0x18] sm:$0xff] (!%p240_p9)  ;;  %612 = vmatprep.mubr.msk.f32.mxu1 (!%p240_p9), %vm742_vm0, %v743_v6  ;;  %v619_v12 = vpack.c.bf16 (!%p240_p9), %v278_v5, %v277_v2  ;;  %v365_v14 = vld [vmem:[%s940_s3 + $0x20] sm:$0xff] (!%p240_p9)  ;;  %vm378_vm2 = vcmask (!%p240_p9), 523264   ;;  %s267_s18 = sand.u32 (!%p240_p9), 1, %s731_s25   ;;  %s568_s29 = sshll.u32 (!%p240_p9), %s806_s28, 7 }
  0x10   : > { %617 = vmatpush3.bf16.msra.mxu0 (!%p240_p9), %v616_v4  ;;  %v625_v13 = vpack.c.bf16 (!%p240_p9), %v364_v11, %v363_v10  ;;  %v366_v15 = vld [vmem:[%s940_s3 + $0x28] sm:$0xff] (!%p240_p9)  ;;  %v367_v18 = vld [vmem:[%s940_s3 + $0x30] sm:$0xff] (!%p240_p9)  ;;  %v368_v19 = vld [vmem:[%s940_s3 + $0x38] sm:$0xff] (!%p240_p9)  ;;  %s559_s19 = sshll.u32 (!%p240_p9), %s267_s18, 3 }
  0x11   : > { %618 = vmatprep.subr.bf16.mxu0 (!%p240_p9), %v741_v3  ;;  %623 = vmatpush3.bf16.msra.mxu1 (!%p240_p9), %v622_v9  ;;  %v628_v17 = vpack.c.bf16 (!%p240_p9), %v366_v15, %v365_v14  ;;  %v631_v20 = vpack.c.bf16 (!%p240_p9), %v368_v19, %v367_v18  ;;  %v561_v21 = vld [vmem:[%s939_s2] ss:$0 sm:$0xff] (!%p240_p9)  ;;  %s269_s8 = scalar_lea.vmem (!%p240_p9), [#allocation2], %s559_s19 }
  0x12   : > { %624 = vmatprep.subr.bf16.mxu1 (!%p240_p9), %v741_v3  ;;  %v563_v26 = vld [vmem:[%s941_s4] ss:$0 sm:$0xff] (!%p240_p9)  ;;  %s496_s9 = sshll.u32 (!%p240_p9), %s269_s8, 4  ;;  %s896_s9 = int_to_ptr.vmem [resolvable:$true] %s496_s9 }
  0x13   : > { %v565_v41 = vld [vmem:[%s942_s5] ss:$0 sm:$0xff] (!%p240_p9)  ;;  %s677_s17 = scalar_lea.vmem (!%p240_p9), %s896_s9, 128 }
  0x14   : > { %620 = vmatpush3.bf16.msra.mxu0 (!%p240_p9), %v619_v12  ;;  %v566_v43 = vld [vmem:[%s943_s6] ss:$0 sm:$0xff] (!%p240_p9)  ;;  %p678_p11 = scmp.ne.s32.totalorder (!%p240_p9), %s896_s9, %s677_s17 }
  0x15   : > { %s271_s15 = scalar_select %p270_p10, %s806_s28, 1  ;;  %626 = vmatpush3.bf16.msra.mxu1 %v625_v13 }
  0x16   : > { %627 = vmatprep.subr.bf16.mxu1 %v741_v3  ;;  %p679_p12 = pnand %p678_p11, %p823_p5  ;;  %s744_s28 = smov [#allocation2]  }
  0x17   : > { %s560_s16 = sshll.u32 %s271_s15, 3  ;;  %s894_s15 = scalar_lea.hbm %s944_s7, %s568_s29 }
  0x18   : > { %s273_s23 = scalar_lea.vmem %s937_s0, %s560_s16  ;;  %s483_s16 = scalar_lea.sflag [#allocation3], %s267_s18 }
  0x19   : > { %v274_v16 = vld [vmem:[%s273_s23] sm:$0xff]  ;;  %629 = vmatpush3.bf16.msra.mxu1 %v628_v17  ;;  %p680_p13 = pneg %p679_p12  ;;  %s681_s19 = sshll.u32 %s744_s28, 4  ;;  %s682_s19 = int_to_ptr.vmem [resolvable:$false] %s681_s19 }
  0x1a   : > { %594 = vmatmul.mubr.msk.f32.vlgmr.msra.gmra.mrb[0].mxu0 %vm286_vm1, %v274_v16  ;;  %630 = vmatprep.subr.bf16.mxu1 %v741_v3  ;;  %s683_s20 = scalar_lea.vmem %s682_s19, 256  ;;  %p684_p0 = scmp.lt.s32.totalorder %s896_s9, %s682_s19 }
  0x1b   : > { %p685_p1 = scmp.lt.s32.totalorder %s683_s20, %s677_s17 }
  0x1d   : > { %632 = vmatpush3.bf16.msra.mxu1 %v631_v20  ;;  %p686_p2 = por %p685_p1, %p684_p0 }
  0x1f   : > { %p687_p3 = pnand %p686_p2, %p680_p13 }
  0xed   : > { %v356_v22 = vpop.f32.mrb[0].mxu0 }
  0xee   : > { %v357_v23 = vadd.f32 %v561_v21, %v356_v22  ;;  %v595_v24 = vpop.f32.mrb[1].mxu0 }
  0xf0   : > { %v360_v25 = vmax.f32 %v357_v23, 0.0 }
  0xf2   : > { %613 = vmatmul.mubr.msk.f32.vlgmr.msra.gmra.mrb[0].mxu1 %vm378_vm2, %v360_v25 }
 0x1c5   : > { %v448_v27 = vpop.f32.mrb[0].mxu1 }
 0x1c6   : > { %v449_v28 = vadd.f32 %v563_v26, %v448_v27  ;;  %v614_v29 = vpop.f32.mrb[1].mxu1 }
 0x1c8   : > { %v452_v30 = vadd.f32 %v449_v28, %v274_v16 }
 0x1ca   : > { %v453_v31 = vsel %vm286_vm1, %v452_v30, 0.0 }
 0x1cb   : > { %454 = vadd.xlane.f32.xlu0 %v453_v31 }
 0x258   : > { %v455_v32 = vpop.xlane.xlu0 %454 }
 0x259   : > { %v457_v33 = vmul.f32 0.03125, %v455_v32 }
 0x25b   : > { %v458_v34 = vsub.f32 %v452_v30, %v457_v33 }
 0x25d   : > { %v459_v35 = vmul.f32 %v458_v34, %v458_v34 }
 0x25f   : > { %v460_v36 = vsel %vm286_vm1, %v459_v35, 0.0 }
 0x260   : > { %461 = vadd.xlane.f32.xlu0 %v460_v36 }
 0x2ed   : > { %v462_v37 = vpop.xlane.xlu0 %461 }
 0x2ee   : > { %v463_v38 = vmul.f32 0.03125, %v462_v37 }
 0x2f0   : > { %v464_v39 = vadd.f32 1e-06, %v463_v38 }
 0x2f2   : > { %675 = vrsqrt.f32 %v464_v39 }
 0x2fc   : > { %v676_v40 = vpop.eup %675 }
 0x2fd   : > { %v466_v42 = vmul.f32 %v676_v40, %v458_v34 }
 0x2ff   : > { %v473_v44 = vmul.f32 %v565_v41, %v466_v42 }
 0x301   : > { %v480_v45 = vadd.f32 %v566_v43, %v473_v44 }
 0x303   : > { %481 = vst.msk [vmem:[%s269_s8] sm:$0xff] %vm286_vm1, %v480_v45 }
 0x304   : > { %690 = shalt.err (!%p687_p3)
}
 0x305   : > { %s691_s18 = scalar_lea.hbm %s894_s15, 128  ;;  %s695_s23 = scalar_lea.hbm %s944_s7, 256 }
 0x306   : > { %p692_p4 = scmp.ne.s32.totalorder %s894_s15, %s691_s18  ;;  %p696_p9 = scmp.lt.u32.totalorder %s894_s15, %s944_s7 }
 0x307   : > { %p697_p10 = scmp.lt.u32.totalorder %s695_s23, %s691_s18  ;;  %p699_p12 = scmp.lt.u32.totalorder %s691_s18, %s894_s15 }
 0x308   : > { %p693_p7 = pnand %p692_p4, %p823_p5 }
 0x309   : > { %p698_p11 = por %p697_p10, %p696_p9 }
 0x30a   : > { %p694_p8 = pneg %p693_p7 }
 0x30b   : > { %p700_p13 = por %p699_p12, %p698_p11 }
 0x30d   : > { %p701_p0 = pnand %p700_p13, %p694_p8 }
 0x30f   : > { %704 = shalt.err (!%p701_p0)
}
 0x310   : > { %633 = dma.vmem_to_hbm [thread:$0]  (%p823_p5), %s896_s9, 128, %s894_s15, %s483_s16  }
 0x311 PF: > { %p639_p1 = scmp.ge.s32.totalorder %s739_s27, 2  ;;  %s508_s13 = sand.u32 1, %s727_s24  }
 0x312   : > { %s509_s14 = scalar_lea.sflag [#allocation3], %s508_s13 }
 0x313   : > { %p636_p2 = pnand %p639_p1, %p827_p6 }
 0x315   : > { %722 = dma.done.wait (!%p636_p2), %s509_s14, 128  }
 0x316   : > { %724 = vsyncadd (!%p636_p2), %s509_s14, 4294967168  ;;  %p17_p3 = scmp.ge.s32.totalorder %s810_s30, 4   ;;  %s947_s24 = smov %s731_s25 }
 0x317   : > { %s948_s25 = smov %s735_s26  ;;  %s949_s26 = smov %s821_s10 }
 0x318   : > { %s950_s27 = smov %s810_s30  ;;  %19 = sbr.rel (!%p17_p3) target bundleno = 3 (0x3), region = 83 }
 0x31f   :  { %514 = vsyncpa [#allocation3], 1 }
 0x320   :  { %516 = vsyncpa [#allocation3 + $0x1], 1 }

</bundles_post_ra>
